<compile_context>
chip_gen: v5e
topology: v5e:2x2
jax: 0.10.0
libtpu: 0.0.40
codegen_flags: <defaults>
</compile_context>

<pallas_src>
import functools
import math

import jax
import jax.numpy as jnp
from jax import lax
from jax.experimental import pallas as pl
from jax.experimental.pallas import tpu as pltpu

EPS = 1e-6


def _round_up(x, m):
    return ((x + m - 1) // m) * m


def _ln_coef(alpha, bias, eps=EPS):
    """Fused LayerNormalization coefficient alpha * bias / eps, shape (1,)."""
    return (alpha.reshape(-1)[:1].astype(jnp.float32)
            * bias.reshape(-1)[:1].astype(jnp.float32) * (1.0 / eps))


# ---------------------------------------------------------------------------
# Standalone LayerNormalization kernel (fallback for huge D + unit check)
# ---------------------------------------------------------------------------
def _layernorm_kernel(coef_ref, x_ref, o_ref):
    x = x_ref[...].astype(jnp.float32)
    d = x.shape[-1]
    mean = jnp.mean(x, axis=-1, keepdims=True)
    diff = x - mean
    var = jnp.sum(diff * diff, axis=-1, keepdims=True) * (1.0 / (d - 1))  # ddof=1
    scale = lax.rsqrt(var) * coef_ref[0]          # rsqrt on the EUP
    o_ref[...] = (diff * scale).astype(o_ref.dtype)


def layer_norm_pallas(x, alpha, bias, *, eps=EPS):
    """x: (..., D). alpha, bias: the module's shape-(1,) parameters."""
    orig_shape = x.shape
    D = orig_shape[-1]
    assert D > 1, "unbiased std (ddof=1) needs D > 1"
    x2 = x.reshape(-1, D)
    rows = x2.shape[0]

    # Row tile sized so one (block_rows, D) f32 buffer <= ~2 MiB (fits the
    # scoped-VMEM budget double-buffered on v5e/v6e and v7x).
    block_rows = min(2048, max(8, (2 * 1024 * 1024) // (D * 4)))
    block_rows = max(8, (block_rows // 8) * 8)
    rows_ceil8 = _round_up(rows, 8)
    block_rows = min(block_rows, rows_ceil8)

    grid = pl.cdiv(rows, block_rows)
    rows_padded = grid * block_rows
    if rows_padded != rows:
        # NOTE: padded zero rows produce NaN (0 * inf) — they are sliced off.
        x2 = jnp.pad(x2, ((0, rows_padded - rows), (0, 0)))

    coef = _ln_coef(alpha, bias, eps)

    out = pl.pallas_call(
        _layernorm_kernel,
        out_shape=jax.ShapeDtypeStruct((rows_padded, D), x.dtype),
        grid_spec=pltpu.PrefetchScalarGridSpec(
            num_scalar_prefetch=0,
            grid=(grid,),
            in_specs=[
                pl.BlockSpec(memory_space=pltpu.SMEM),            # fused coef
                pl.BlockSpec((block_rows, D), lambda i: (i, 0)),
            ],
            out_specs=pl.BlockSpec((block_rows, D), lambda i: (i, 0)),
        ),
        compiler_params=pltpu.CompilerParams(
            dimension_semantics=("parallel",)),
        cost_estimate=pl.CostEstimate(
            flops=6 * rows_padded * D,
            transcendentals=rows_padded,
            bytes_accessed=2 * rows_padded * D * 4),
    )(coef, x2)

    if rows_padded != rows:
        out = out[:rows]
    return out.reshape(orig_shape)


# ---------------------------------------------------------------------------
# Linear: y = [LN(x)] @ W^T + b [+relu] [+residual]   (tiled MXU matmul)
#   - W is kept in its PyTorch (out_features, in_features) layout (no W.T).
#   - optional LayerNorm prologue (K must be a single unpadded k-tile).
#   - optional residual add fused into the epilogue.
# ---------------------------------------------------------------------------
def _make_linear_kernel(*, apply_relu, has_residual, fuse_ln, use_bf16):
    def kernel(*refs):
        idx = 0
        if fuse_ln:
            coef_ref = refs[idx]; idx += 1
        x_ref, w_ref, b_ref = refs[idx], refs[idx + 1], refs[idx + 2]; idx += 3
        if has_residual:
            r_ref = refs[idx]; idx += 1
        o_ref, acc_ref = refs[idx], refs[idx + 1]

        @pl.when(pl.program_id(2) == 0)
        def _():
            acc_ref[...] = jnp.zeros_like(acc_ref)

        x = x_ref[...]
        if fuse_ln:
            # LayerNormalization fused into the matmul prologue (K is one tile):
            # alpha*(x-mean)/(std*eps)*bias with std = sqrt(sum(d^2)/(D-1)).
            xf = x.astype(jnp.float32)
            d = xf.shape[-1]
            mean = jnp.mean(xf, axis=-1, keepdims=True)
            diff = xf - mean
            var = jnp.sum(diff * diff, axis=-1, keepdims=True) * (1.0 / (d - 1))
            x = diff * (lax.rsqrt(var) * coef_ref[0])
        w = w_ref[...]
        if use_bf16:
            x = x.astype(jnp.bfloat16)
            w = w.astype(jnp.bfloat16)
        # x (tm, tk) @ w (tn, tk)^T -> (tm, tn); weight stays in (N, K) layout.
        acc_ref[...] += lax.dot_general(
            x, w, (((1,), (1,)), ((), ())), preferred_element_type=jnp.float32)

        @pl.when(pl.program_id(2) == pl.num_programs(2) - 1)
        def _():
            y = acc_ref[...] + b_ref[...]
            if apply_relu:
                y = jnp.maximum(y, 0.0)
            if has_residual:
                y = y + r_ref[...].astype(jnp.float32)
            o_ref[...] = y.astype(o_ref.dtype)

    return kernel


def linear_pallas(x2, w, bias=None, *, apply_relu=False, residual=None,
                  ln_coef=None, use_bf16=False):
    """x2: (M, K); w: (N, K) PyTorch layout; bias: (N,) or None;
    residual: (M, N) or None; ln_coef: (1,) fused LN coefficient or None."""
    M, K = x2.shape
    N, K2 = w.shape
    assert K == K2
    if residual is not None:
        assert residual.shape == (M, N)
    out_dtype = x2.dtype
    fuse_ln = ln_coef is not None

    # ---- tile selection: pad to tile multiples instead of falling back to a
    #      full-dimension tile on non-divisible shapes (VMEM-safe on v7x) ----
    tm = 256 if M > 256 else _round_up(M, 8)
    M_pad = _round_up(M, tm)
    if N > 1024:
        tn, N_pad = 256, _round_up(N, 256)
    else:
        tn, N_pad = N, N
    if K > 1024 and not fuse_ln:
        tk, K_pad = 512, _round_up(K, 512)
    else:
        tk, K_pad = K, K        # fused LN requires a single, unpadded k-tile

    b_vec = (jnp.zeros((N,), jnp.float32) if bias is None
             else bias.reshape(-1).astype(jnp.float32))
    x_in, w_in, b_in, r_in = x2, w, b_vec, residual

    if K_pad != K:
        x_in = jnp.pad(x_in, ((0, 0), (0, K_pad - K)))
        w_in = jnp.pad(w_in, ((0, 0), (0, K_pad - K)))
    if M_pad != M:
        # NOTE: with fused LN, padded zero rows become NaN; they are sliced off.
        x_in = jnp.pad(x_in, ((0, M_pad - M), (0, 0)))
        if r_in is not None:
            r_in = jnp.pad(r_in, ((0, M_pad - M), (0, 0)))
    if N_pad != N:
        w_in = jnp.pad(w_in, ((0, N_pad - N), (0, 0)))
        b_in = jnp.pad(b_in, (0, N_pad - N))
        if r_in is not None:
            r_in = jnp.pad(r_in, ((0, 0), (0, N_pad - N)))
    b_in = b_in.reshape(1, N_pad)

    kernel = _make_linear_kernel(apply_relu=apply_relu,
                                 has_residual=residual is not None,
                                 fuse_ln=fuse_ln, use_bf16=use_bf16)

    in_specs, args = [], []
    if fuse_ln:
        in_specs.append(pl.BlockSpec(memory_space=pltpu.SMEM))
        args.append(jnp.asarray(ln_coef, jnp.float32).reshape(1))
    in_specs += [
        pl.BlockSpec((tm, tk), lambda i, j, k: (i, k)),
        pl.BlockSpec((tn, tk), lambda i, j, k: (j, k)),   # weight in (N, K)
        pl.BlockSpec((1, tn), lambda i, j, k: (0, j)),
    ]
    args += [x_in, w_in, b_in]
    if residual is not None:
        in_specs.append(pl.BlockSpec((tm, tn), lambda i, j, k: (i, j)))
        args.append(r_in)

    # TODO(synk): for decode-like tiny-M shapes, pl.Buffered(3) on the weight
    # spec would deepen weight streaming; left at the default double buffer.
    out = pl.pallas_call(
        kernel,
        out_shape=jax.ShapeDtypeStruct((M_pad, N_pad), out_dtype),
        grid_spec=pltpu.PrefetchScalarGridSpec(
            num_scalar_prefetch=0,
            grid=(M_pad // tm, N_pad // tn, K_pad // tk),
            in_specs=in_specs,
            out_specs=pl.BlockSpec((tm, tn), lambda i, j, k: (i, j)),
            scratch_shapes=[pltpu.VMEM((tm, tn), jnp.float32)],
        ),
        compiler_params=pltpu.CompilerParams(
            dimension_semantics=("parallel", "parallel", "arbitrary")),
    )(*args)

    if M_pad != M or N_pad != N:
        out = out[:M, :N]
    return out


def _ln_then_linear(x2, w, b, alpha, ln_bias, **kw):
    """LayerNormalization -> Linear; fuse the norm into the matmul prologue
    whenever the feature dim fits a single k-tile."""
    K = x2.shape[-1]
    if K <= 2048:
        return linear_pallas(x2, w, b, ln_coef=_ln_coef(alpha, ln_bias), **kw)
    n = layer_norm_pallas(x2, alpha, ln_bias)
    return linear_pallas(n, w, b, **kw)


# ---------------------------------------------------------------------------
# Attention: all heads of one (batch, q-tile) per grid step, flash-style
# online softmax along the KV grid axis; k and v read from the SAME ref
# (the module's shared w_k == w_v and k is v guarantee key == value).
# ---------------------------------------------------------------------------
def _mha_kernel(q_ref, kv_ref, m_ref, o_ref, m_sc, l_sc, acc_sc, *,
                sm_scale, num_heads):
    kv_step = pl.program_id(2)

    @pl.when(kv_step == 0)
    def _():
        m_sc[...] = jnp.full_like(m_sc, -jnp.inf)
        l_sc[...] = jnp.zeros_like(l_sc)
        acc_sc[...] = jnp.zeros_like(acc_sc)

    dk = q_ref.shape[-1] // num_heads
    q = q_ref[0].astype(jnp.float32)            # (tq,  D) lane-dense load
    kv = kv_ref[0].astype(jnp.float32)          # (tkv, D) serves as K and V
    masked = m_ref[0] == 0                      # (tq, tkv) int8 -> bool

    for hh in range(num_heads):                 # static unroll over heads
        sl = slice(hh * dk, (hh + 1) * dk)
        s = lax.dot_general(q[:, sl], kv[:, sl], (((1,), (1,)), ((), ())),
                            preferred_element_type=jnp.float32) * sm_scale
        # TODO(synk): reference calls nonexistent Tensor.mask_fill_; we apply
        # masked_fill semantics (mask == 0 -> -1e9), its clear intent.
        s = jnp.where(masked, -1e9, s)
        m_prev = m_sc[hh]
        m_new = jnp.maximum(m_prev, jnp.max(s, axis=-1, keepdims=True))
        a = jnp.exp(m_prev - m_new)
        p = jnp.exp(s - m_new)
        l_sc[hh] = a * l_sc[hh] + jnp.sum(p, axis=-1, keepdims=True)
        acc_sc[hh] = a * acc_sc[hh] + jnp.dot(p, kv[:, sl],
                                              preferred_element_type=jnp.float32)
        m_sc[hh] = m_new

    @pl.when(kv_step == pl.num_programs(2) - 1)
    def _():
        inv_l = pl.reciprocal(l_sc[...], approx=True)     # EUP reciprocal
        for hh in range(num_heads):
            o_ref[0, :, hh * dk:(hh + 1) * dk] = (
                acc_sc[hh] * inv_l[hh]).astype(o_ref.dtype)


def attention_pallas(qp, kvp, mask, num_heads, B, Sq, Skv, out_dtype):
    """qp: (B*Sq, D) projected queries; kvp: (B*Skv, D) projected keys==values.
    Returns (B*Sq, D) with heads already concatenated (contiguous, no XLA-level
    transposes)."""
    D = qp.shape[-1]
    assert D % num_heads == 0
    dk = D // num_heads
    q3 = qp.reshape(B, Sq, D)
    kv3 = kvp.reshape(B, Skv, D)

    # (B, Sq, Skv) int8 mask — head broadcast never materialized.
    if mask is None:
        m3 = jnp.ones((B, Sq, Skv), jnp.int8)
    else:
        # TODO(synk): assumes the mask head dim (if present) is broadcastable
        # (size 1), as in the reference usage.
        m3 = (jnp.broadcast_to(mask != 0, (B, 1, Sq, Skv))
              .reshape(B, Sq, Skv).astype(jnp.int8))

    # Tile Sq / Skv so the per-step working set stays well inside scoped VMEM
    # (v7x: 64 MiB physical / 32 MiB scoped default).
    tile = 512
    while tile > 128 and 4 * (num_heads * tile * tile + 3 * tile * D) > (12 << 20):
        tile //= 2
    if Sq <= tile:
        tq, Sq_pad = Sq, Sq
    else:
        tq, Sq_pad = tile, _round_up(Sq, tile)
    if Skv <= tile:
        tkv, Skv_pad = Skv, Skv
    else:
        tkv, Skv_pad = tile, _round_up(Skv, tile)
    if Sq_pad != Sq:
        q3 = jnp.pad(q3, ((0, 0), (0, Sq_pad - Sq), (0, 0)))
        m3 = jnp.pad(m3, ((0, 0), (0, Sq_pad - Sq), (0, 0)))
    if Skv_pad != Skv:
        kv3 = jnp.pad(kv3, ((0, 0), (0, Skv_pad - Skv), (0, 0)))
        m3 = jnp.pad(m3, ((0, 0), (0, 0), (0, Skv_pad - Skv)))   # 0 -> masked

    kernel = functools.partial(_mha_kernel, sm_scale=1.0 / math.sqrt(dk),
                               num_heads=num_heads)
    out = pl.pallas_call(
        kernel,
        out_shape=jax.ShapeDtypeStruct((B, Sq_pad, D), out_dtype),
        grid_spec=pltpu.PrefetchScalarGridSpec(
            num_scalar_prefetch=0,
            grid=(B, Sq_pad // tq, Skv_pad // tkv),
            in_specs=[
                pl.BlockSpec((1, tq, D), lambda b, i, k: (b, i, 0)),
                pl.BlockSpec((1, tkv, D), lambda b, i, k: (b, k, 0)),
                pl.BlockSpec((1, tq, tkv), lambda b, i, k: (b, i, k)),
            ],
            out_specs=pl.BlockSpec((1, tq, D), lambda b, i, k: (b, i, 0)),
            scratch_shapes=[
                pltpu.VMEM((num_heads, tq, 1), jnp.float32),    # running max
                pltpu.VMEM((num_heads, tq, 1), jnp.float32),    # running denom
                pltpu.VMEM((num_heads, tq, dk), jnp.float32),   # running numer
            ],
        ),
        compiler_params=pltpu.CompilerParams(
            dimension_semantics=("parallel", "parallel", "arbitrary")),
    )(q3, kv3, m3)

    if Sq_pad != Sq:
        out = out[:, :Sq]
    return out.reshape(B * Sq, D)


# ---------------------------------------------------------------------------
# DecoderBlock.forward (pre-norm residual connections)
# ---------------------------------------------------------------------------
def decoder_block_forward(x, encoder_output, src_mask, tgt_mask, params, *,
                          use_bf16=False):
    h = params["h"]
    B, S, D = x.shape
    Se = encoder_output.shape[1]
    x2 = x.reshape(B * S, D)
    enc2 = encoder_output.reshape(B * Se, D)
    w_self, w_cross = params["w_self"], params["w_cross"]

    # TODO(synk): ResidualConnection.dropout is a raw float in the reference
    # (calling it would TypeError); treated as identity (inference dropout).
    # TODO(synk): the reference applies w_o on the (B, -1, h, d_k) view, which is
    # shape-inconsistent for h > 1; we apply it on the concatenated heads.

    # ---- self-attention sublayer: q == k == v and shared weight -> ONE proj
    qkv = _ln_then_linear(x2, w_self, None,
                          params["norm0_alpha"], params["norm0_bias"],
                          use_bf16=use_bf16)
    attn = attention_pallas(qkv, qkv, tgt_mask, h, B, S, S, x.dtype)
    x2 = linear_pallas(attn, w_self, None, residual=x2, use_bf16=use_bf16)

    # ---- cross-attention sublayer: k == v == encoder_output -> ONE kv proj
    qp = _ln_then_linear(x2, w_cross, None,
                         params["norm1_alpha"], params["norm1_bias"],
                         use_bf16=use_bf16)
    kvp = linear_pallas(enc2, w_cross, None, use_bf16=use_bf16)
    attn = attention_pallas(qp, kvp, src_mask, h, B, S, Se, x.dtype)
    x2 = linear_pallas(attn, w_cross, None, residual=x2, use_bf16=use_bf16)

    # ---- feed-forward sublayer (LN fused into linear_1, residual into linear_2)
    h1 = _ln_then_linear(x2, params["ff_w1"], params["ff_b1"],
                         params["norm2_alpha"], params["norm2_bias"],
                         apply_relu=True, use_bf16=use_bf16)
    # TODO(synk): reference linear_2 = nn.Linear(d_model, d_ff); only
    # shape-consistent when d_ff == d_model (its dropout is identity here).
    x2 = linear_pallas(h1, params["ff_w2"], params["ff_b2"], residual=x2,
                       use_bf16=use_bf16)

    return x2.reshape(B, S, D)


# ---------------------------------------------------------------------------
# Pure-JAX reference of the same forward (for the self-check)
# ---------------------------------------------------------------------------
_HI = jax.lax.Precision.HIGHEST


def _ref_layernorm(x, alpha, bias, eps=EPS):
    mean = jnp.mean(x, axis=-1, keepdims=True)
    var = jnp.sum((x - mean) ** 2, axis=-1, keepdims=True) / (x.shape[-1] - 1)
    std = jnp.sqrt(var)
    return alpha * (x - mean) / (std * eps) * bias


def _ref_mha(q, k, v, mask, W, h):
    B, Sq, D = q.shape
    dk = D // h
    proj = lambda t: jnp.einsum("bsd,od->bso", t, W, precision=_HI)
    split = lambda t: t.reshape(B, -1, h, dk).transpose(0, 2, 1, 3)
    qh, kh, vh = split(proj(q)), split(proj(k)), split(proj(v))
    scores = jnp.einsum("bhqd,bhkd->bhqk", qh, kh, precision=_HI) / math.sqrt(dk)
    scores = jnp.where(mask == 0, -1e9, scores)
    p = jax.nn.softmax(scores, axis=-1)
    o = jnp.einsum("bhqk,bhkd->bhqd", p, vh, precision=_HI)
    o = o.transpose(0, 2, 1, 3).reshape(B, Sq, D)
    return jnp.einsum("bsd,od->bso", o, W, precision=_HI)


def _ref_ffn(x, w1, b1, w2, b2):
    h1 = jnp.maximum(jnp.einsum("bsd,fd->bsf", x, w1, precision=_HI) + b1, 0.0)
    return jnp.einsum("bsf,of->bso", h1, w2, precision=_HI) + b2


def reference_forward(x, enc, src_mask, tgt_mask, p):
    n = _ref_layernorm(x, p["norm0_alpha"], p["norm0_bias"])
    x = x + _ref_mha(n, n, n, tgt_mask, p["w_self"], p["h"])
    n = _ref_layernorm(x, p["norm1_alpha"], p["norm1_bias"])
    x = x + _ref_mha(n, enc, enc, src_mask, p["w_cross"], p["h"])
    n = _ref_layernorm(x, p["norm2_alpha"], p["norm2_bias"])
    x = x + _ref_ffn(n, p["ff_w1"], p["ff_b1"], p["ff_w2"], p["ff_b2"])
    return x


if __name__ == "__main__":
    key = jax.random.PRNGKey(0)
    kx, ke, kws, kwc, kw1, kb1, kw2, kb2 = jax.random.split(key, 8)

    # d_model=128 keeps the lane dimension dense; encoder seq != decoder seq to
    # exercise the cross-attention path.
    B, S, SE, D, H = 2, 8, 16, 128, 4
    D_FF = D  # TODO(synk): FeedForwardBlock only composes when d_ff == d_model.

    x = jax.random.normal(kx, (B, S, D), dtype=jnp.float32)
    encoder_output = jax.random.normal(ke, (B, SE, D), dtype=jnp.float32)
    tgt_mask = jnp.broadcast_to(jnp.tril(jnp.ones((S, S), jnp.float32)),
                                (B, 1, S, S))
    src_mask = jnp.ones((B, 1, 1, SE), jnp.float32).at[:, :, :, -1:].set(0.0)

    wscale = 1.0 / math.sqrt(D)
    # NOTE: with default norm params (alpha=1, bias=0) the block is exactly the
    # identity, and with O(1) bias the /(std*eps) term blows activations to ~1e6
    # (the formula is reproduced faithfully regardless).  The demo uses
    # bias = c*eps so alpha*bias/eps stays O(1) and the numeric check is useful.
    params = {
        "h": H,
        "norm0_alpha": jnp.ones((1,), jnp.float32),
        "norm0_bias": jnp.full((1,), 0.50 * EPS, jnp.float32),
        "norm1_alpha": jnp.ones((1,), jnp.float32),
        "norm1_bias": jnp.full((1,), 0.75 * EPS, jnp.float32),
        "norm2_alpha": jnp.ones((1,), jnp.float32),
        "norm2_bias": jnp.full((1,), 1.00 * EPS, jnp.float32),
        "w_self": jax.random.normal(kws, (D, D), jnp.float32) * wscale,
        "w_cross": jax.random.normal(kwc, (D, D), jnp.float32) * wscale,
        "ff_w1": jax.random.normal(kw1, (D_FF, D), jnp.float32) * wscale,
        "ff_b1": jax.random.normal(kb1, (D_FF,), jnp.float32) * 0.1,
        "ff_w2": jax.random.normal(kw2, (D_FF, D), jnp.float32) * wscale,
        "ff_b2": jax.random.normal(kb2, (D_FF,), jnp.float32) * 0.1,
    }

    out = decoder_block_forward(x, encoder_output, src_mask, tgt_mask, params)
    out = jax.block_until_ready(out)
    assert out.shape == (B, S, D)

    # Tight check on the standalone LayerNorm kernel (no MXU precision effects).
    ln = layer_norm_pallas(x, params["norm0_alpha"], params["norm0_bias"])
    ln_ref = _ref_layernorm(x, params["norm0_alpha"], params["norm0_bias"])
    assert jnp.allclose(ln, ln_ref, rtol=1e-5, atol=1e-5), "layernorm mismatch"

    # End-to-end check; tolerance absorbs MXU-precision and approx-reciprocal
    # deltas across the matmul chain (values are O(1); semantic bugs would be
    # O(1) off).
    ref = reference_forward(x, encoder_output, src_mask, tgt_mask, params)
    assert jnp.allclose(out, ref, rtol=3e-2, atol=3e-2), "decoder block mismatch"
    assert bool(jnp.all(jnp.isfinite(out)))

    print("KERNEL_OK")
</pallas_src>

<mosaic_0001>
module attributes {stable_mosaic.version = 11 : i64} {
  func.func @kernel(%arg0: i32, %arg1: i32, %arg2: i32, %arg3: memref<1xf32, #tpu.memory_space<smem>>, %arg4: memref<16x128xf32, #tpu.memory_space<vmem>>, %arg5: memref<128x128xf32, #tpu.memory_space<vmem>>, %arg6: memref<1x128xf32, #tpu.memory_space<vmem>>, %arg7: memref<16x128xf32, #tpu.memory_space<vmem>>, %arg8: memref<16x128xf32, #tpu.memory_space<vmem>>) attributes {dimension_semantics = [#tpu.dimension_semantics<parallel>, #tpu.dimension_semantics<parallel>, #tpu.dimension_semantics<arbitrary>], iteration_bounds = array<i64: 1, 1, 1>, scalar_prefetch = 0 : i64, scratch_operands = 1 : i64, tpu.core_type = #tpu.core_type<tc>, window_params = [{transform_indices = @transform_0, window_bounds = array<i64: 1>}, {transform_indices = @transform_1, window_bounds = array<i64: 16, 128>}, {transform_indices = @transform_2, window_bounds = array<i64: 128, 128>}, {transform_indices = @transform_3, window_bounds = array<i64: 1, 128>}, {transform_indices = @transform_4, window_bounds = array<i64: 16, 128>}]} {
    %c0_i32 = arith.constant 0 : i32
    %0 = arith.cmpi eq, %arg2, %c0_i32 : i32
    %1 = arith.extui %0 : i1 to i32
    %c0_i32_0 = arith.constant 0 : i32
    %2 = arith.cmpi ne, %1, %c0_i32_0 : i32
    scf.if %2 {
      %cst_15 = arith.constant 0.000000e+00 : f32
      %29 = vector.broadcast %cst_15 : f32 to vector<16x128xf32>
      %c0_16 = arith.constant 0 : index
      %c0_17 = arith.constant 0 : index
      %30 = vector.load %arg8[%c0_16, %c0_17] : memref<16x128xf32, #tpu.memory_space<vmem>>, vector<16x128xf32>
      tpu.vector_store %arg8[%c0_16, %c0_17], %29 {strides = array<i32>} : memref<16x128xf32, #tpu.memory_space<vmem>>, vector<16x128xf32>,
    } else {
    }
    %c0 = arith.constant 0 : index
    %c0_1 = arith.constant 0 : index
    %3 = vector.load %arg4[%c0, %c0_1] : memref<16x128xf32, #tpu.memory_space<vmem>>, vector<16x128xf32>
    %cst = arith.constant dense<0.000000e+00> : vector<16xf32>
    %4 = vector.multi_reduction <add>, %3, %cst [1] : vector<16x128xf32> to vector<16xf32>
    %5 = vector.shape_cast %4 : vector<16xf32> to vector<16x1xf32>
    %cst_2 = arith.constant 1.280000e+02 : f32
    %6 = vector.broadcast %cst_2 : f32 to vector<16x1xf32>
    %7 = arith.divf %5, %6 : vector<16x1xf32>
    %8 = vector.broadcast %7 : vector<16x1xf32> to vector<16x128xf32>
    %9 = arith.subf %3, %8 : vector<16x128xf32>
    %10 = arith.mulf %9, %9 : vector<16x128xf32>
    %cst_3 = arith.constant dense<0.000000e+00> : vector<16xf32>
    %11 = vector.multi_reduction <add>, %10, %cst_3 [1] : vector<16x128xf32> to vector<16xf32>
    %12 = vector.shape_cast %11 : vector<16xf32> to vector<16x1xf32>
    %cst_4 = arith.constant 0.00787401571 : f32
    %13 = vector.broadcast %cst_4 : f32 to vector<16x1xf32>
    %14 = arith.mulf %12, %13 : vector<16x1xf32>
    %15 = math.rsqrt %14 : vector<16x1xf32>
    %c0_5 = arith.constant 0 : index
    %16 = memref.load %arg3[%c0_5] : memref<1xf32, #tpu.memory_space<smem>>
    %17 = vector.broadcast %16 : f32 to vector<16x1xf32>
    %18 = arith.mulf %15, %17 : vector<16x1xf32>
    %19 = vector.broadcast %18 : vector<16x1xf32> to vector<16x128xf32>
    %20 = arith.mulf %9, %19 : vector<16x128xf32>
    %c0_6 = arith.constant 0 : index
    %c0_7 = arith.constant 0 : index
    %21 = vector.load %arg5[%c0_6, %c0_7] : memref<128x128xf32, #tpu.memory_space<vmem>>, vector<128x128xf32>
    %c0_8 = arith.constant 0 : index
    %c0_9 = arith.constant 0 : index
    %22 = vector.load %arg8[%c0_8, %c0_9] : memref<16x128xf32, #tpu.memory_space<vmem>>, vector<16x128xf32>
    %cst_10 = arith.constant dense<0.000000e+00> : vector<16x128xf32>
    %23 = tpu.matmul %20, %21, %cst_10 {dimension_numbers = #tpu.dot_dimension_numbers<[1], [1], [0], [0], [0, 0, 1, 0], [], []>} : vector<16x128xf32>, vector<128x128xf32>, vector<16x128xf32> -> vector<16x128xf32>
    %24 = arith.addf %22, %23 : vector<16x128xf32>
    %c0_11 = arith.constant 0 : index
    %c0_12 = arith.constant 0 : index
    %25 = vector.load %arg8[%c0_11, %c0_12] : memref<16x128xf32, #tpu.memory_space<vmem>>, vector<16x128xf32>
    tpu.vector_store %arg8[%c0_11, %c0_12], %24 {strides = array<i32>} : memref<16x128xf32, #tpu.memory_space<vmem>>, vector<16x128xf32>,
    %c0_i32_13 = arith.constant 0 : i32
    %26 = arith.cmpi eq, %arg2, %c0_i32_13 : i32
    %27 = arith.extui %26 : i1 to i32
    %c0_i32_14 = arith.constant 0 : i32
    %28 = arith.cmpi ne, %27, %c0_i32_14 : i32
    scf.if %28 {
      %c0_15 = arith.constant 0 : index
      %c0_16 = arith.constant 0 : index
      %29 = vector.load %arg8[%c0_15, %c0_16] : memref<16x128xf32, #tpu.memory_space<vmem>>, vector<16x128xf32>
      %c0_17 = arith.constant 0 : index
      %c0_18 = arith.constant 0 : index
      %30 = vector.load %arg6[%c0_17, %c0_18] : memref<1x128xf32, #tpu.memory_space<vmem>>, vector<1x128xf32>
      %31 = vector.broadcast %30 : vector<1x128xf32> to vector<16x128xf32>
      %32 = arith.addf %29, %31 : vector<16x128xf32>
      %c0_19 = arith.constant 0 : index
      %c0_20 = arith.constant 0 : index
      %33 = vector.load %arg7[%c0_19, %c0_20] : memref<16x128xf32, #tpu.memory_space<vmem>>, vector<16x128xf32>
      tpu.vector_store %arg7[%c0_19, %c0_20], %32 {strides = array<i32>} : memref<16x128xf32, #tpu.memory_space<vmem>>, vector<16x128xf32>,
    } else {
    }
    return
  }
  func.func @transform_0(%arg0: i32, %arg1: i32, %arg2: i32) -> i32 {
    %c0_i32 = arith.constant 0 : i32
    %c0_i32_0 = arith.constant 0 : i32
    return %c0_i32 : i32
  }
  func.func @transform_1(%arg0: i32, %arg1: i32, %arg2: i32) -> (i32, i32) {
    %c0_i32 = arith.constant 0 : i32
    return %arg0, %arg2 : i32, i32
  }
  func.func @transform_2(%arg0: i32, %arg1: i32, %arg2: i32) -> (i32, i32) {
    %c0_i32 = arith.constant 0 : i32
    return %arg1, %arg2 : i32, i32
  }
  func.func @transform_3(%arg0: i32, %arg1: i32, %arg2: i32) -> (i32, i32) {
    %c0_i32 = arith.constant 0 : i32
    %c0_i32_0 = arith.constant 0 : i32
    return %c0_i32, %arg1 : i32, i32
  }
  func.func @transform_4(%arg0: i32, %arg1: i32, %arg2: i32) -> (i32, i32) {
    %c0_i32 = arith.constant 0 : i32
    return %arg0, %arg1 : i32, i32
  }
}

</mosaic_0001>

<bundles_post_ra>
// kernel: tpu_custom_call.1
= control target key start
LH: loop header
LB: loop body
LE: loop exit
PB: predicated region body
PF: predicated region fallthrough
CT: control target
= control target key end

     0   :  { %10 = vsyncpa [#allocation5], 0  ;;  %s348_s0 = inlined_call_operand.<no memory space> [shape: f32[1], index: 0, kind: input, shape index: {}]   ;;  %s349_s1 = inlined_call_operand.hbm [shape: f32[16,128], index: 1, kind: input, shape index: {}]   ;;  %s350_s2 = inlined_call_operand.hbm [shape: f32[128,128], index: 2, kind: input, shape index: {}]   ;;  %s351_s3 = inlined_call_operand.vmem [shape: f32[1,128], index: 3, kind: input, shape index: {}]   ;;  %s352_s4 = inlined_call_operand.hbm [shape: f32[16,128], index: 4, kind: output, shape index: {}]  }
   0x1   :  { %11 = vsyncpa [#allocation8], 0 }
   0x2   :  { %12 = vsyncpa [#allocation6], 0  ;;  %s19_s17 = sshll.u32 %s349_s1, 4  ;;  %s293_s18 = smov [#allocation4]   ;;  %s20_s17 = int_to_ptr.hbm [resolvable:$true] %s19_s17 }
   0x3   :  { %s21_s19 = sshll.u32 %s293_s18, 4  ;;  %s32_s22 = sshll.u32 %s350_s2, 4  ;;  %s22_s19 = int_to_ptr.vmem [resolvable:$true] %s21_s19  ;;  %s33_s22 = int_to_ptr.hbm [resolvable:$true] %s32_s22 }
   0x4   :  { %s294_s23 = smov 128   ;;  %s295_s24 = smov 8  }
   0x5   :  { %27 = dma.hbm_to_vmem [thread:$0]  %s20_s17, 256, %s22_s19, [#allocation5], %s294_s23, %s294_s23, %s295_s24  }
   0x6   :  { %s296_s25 = smov [#allocation7]  }
   0x7   :  { %s34_s26 = sshll.u32 %s296_s25, 4  ;;  %s35_s26 = int_to_ptr.vmem [resolvable:$true] %s34_s26 }
   0x8   :  { %40 = dma.hbm_to_vmem [thread:$0]  %s33_s22, 2048, %s35_s26, [#allocation8], %s294_s23, %s294_s23, %s295_s24  }
   0x9   :  { %287 = dma.done.wait [#allocation5], 256  }
   0xa   :  { %288 = vsyncadd [#allocation5], 4294967040 }
   0xb   :  { %289 = dma.done.wait [#allocation8], 2048  }
   0xc   :  { %290 = vsyncadd [#allocation8], 4294965248  ;;  %v57_v0 = vld [vmem:[#allocation4] sm:$0xff]  ;;  %v58_v1 = vld [vmem:[#allocation4 + $0x8] sm:$0xff]  ;;  %v297_v2 = vmov 128.0   ;;  %v103_v45 = vstv %s348_s0  ;;  %s298_s0 = smov [#allocation9]  }
   0xd   :  { %59 = vadd.xlane.f32.xlu0 %v57_v0  ;;  %209 = vrcp.f32 %v297_v2  ;;  %v123_v5 = vld [vmem:[#allocation7 + $0x78] sm:$0xff]  ;;  %v122_v6 = vld [vmem:[#allocation7 + $0x70] sm:$0xff]  ;;  %v121_v8 = vld [vmem:[#allocation7 + $0x68] sm:$0xff]  ;;  %s170_s29 = sshll.u32 %s298_s0, 4  ;;  %s172_s6 = sshll.u32 %s352_s4, 4  ;;  %s171_s29 = int_to_ptr.vmem [resolvable:$true] %s170_s29  ;;  %s173_s6 = int_to_ptr.hbm [resolvable:$true] %s172_s6 }
   0xe   :  { %126 = vmatpush.xpose.msra.mxu0 %v123_v5  ;;  %186 = vmatpush.xpose.msra.mxu1 %v123_v5  ;;  %v120_v10 = vld [vmem:[#allocation7 + $0x60] sm:$0xff]  ;;  %v119_v12 = vld [vmem:[#allocation7 + $0x58] sm:$0xff]  ;;  %v118_v16 = vld [vmem:[#allocation7 + $0x50] sm:$0xff] }
   0xf   :  { %v117_v19 = vld [vmem:[#allocation7 + $0x48] sm:$0xff]  ;;  %v116_v22 = vld [vmem:[#allocation7 + $0x40] sm:$0xff]  ;;  %v115_v25 = vld [vmem:[#allocation7 + $0x38] sm:$0xff] }
  0x10   :  { %v114_v26 = vld [vmem:[#allocation7 + $0x30] sm:$0xff]  ;;  %v113_v27 = vld [vmem:[#allocation7 + $0x28] sm:$0xff]  ;;  %v112_v28 = vld [vmem:[#allocation7 + $0x20] sm:$0xff] }
  0x11   :  { %v111_v29 = vld [vmem:[#allocation7 + $0x18] sm:$0xff]  ;;  %v110_v30 = vld [vmem:[#allocation7 + $0x10] sm:$0xff]  ;;  %v109_v31 = vld [vmem:[#allocation7 + $0x8] sm:$0xff] }
  0x12   :  { %127 = vmatpush.xpose.msra.mxu0 %v122_v6  ;;  %187 = vmatpush.xpose.msra.mxu1 %v122_v6  ;;  %v108_v32 = vld [vmem:[#allocation7] sm:$0xff]  ;;  %v208_v56 = vld [vmem:[%s351_s3] ss:$0 sm:$0xff] }
  0x13   :  { %v210_v3 = vpop.eup %209 }
  0x14   :  { %v64_v4 = vmul.f32 128.0, %v210_v3  ;;  %vm68_vm0 = vweird.f32 %v210_v3 }
  0x15   :  { %61 = vadd.xlane.f32.xlu0 %v58_v1 }
  0x16   :  { %v65_v7 = vsub.f32 1.0, %v64_v4  ;;  %128 = vmatpush.xpose.msra.mxu0 %v121_v8  ;;  %188 = vmatpush.xpose.msra.mxu1 %v121_v8 }
  0x18   :  { %v66_v9 = vmul.f32 %v210_v3, %v65_v7 }
  0x1a   :  { %v67_v11 = vadd.f32 %v210_v3, %v66_v9  ;;  %129 = vmatpush.xpose.msra.mxu0 %v120_v10  ;;  %189 = vmatpush.xpose.msra.mxu1 %v120_v10 }
  0x1c   :  { %v69_v13 = vsel %vm68_vm0, %v210_v3, %v67_v11 }
  0x1e   :  { %130 = vmatpush.xpose.msra.mxu0 %v119_v12  ;;  %190 = vmatpush.xpose.msra.mxu1 %v119_v12 }
  0x22   :  { %131 = vmatpush.xpose.msra.mxu0 %v118_v16  ;;  %191 = vmatpush.xpose.msra.mxu1 %v118_v16 }
  0x26   :  { %132 = vmatpush.xpose.msra.mxu0 %v117_v19  ;;  %192 = vmatpush.xpose.msra.mxu1 %v117_v19 }
  0x2a   :  { %133 = vmatpush.xpose.msra.mxu0 %v116_v22  ;;  %193 = vmatpush.xpose.msra.mxu1 %v116_v22 }
  0x2e   :  { %134 = vmatpush.xpose.msra.mxu0 %v115_v25  ;;  %194 = vmatpush.xpose.msra.mxu1 %v115_v25 }
  0x32   :  { %135 = vmatpush.xpose.msra.mxu0 %v114_v26  ;;  %195 = vmatpush.xpose.msra.mxu1 %v114_v26 }
  0x36   :  { %136 = vmatpush.xpose.msra.mxu0 %v113_v27  ;;  %196 = vmatpush.xpose.msra.mxu1 %v113_v27 }
  0x3a   :  { %137 = vmatpush.xpose.msra.mxu0 %v112_v28  ;;  %197 = vmatpush.xpose.msra.mxu1 %v112_v28 }
  0x3e   :  { %138 = vmatpush.xpose.msra.mxu0 %v111_v29  ;;  %198 = vmatpush.xpose.msra.mxu1 %v111_v29 }
  0x42   :  { %139 = vmatpush.xpose.msra.mxu0 %v110_v30  ;;  %199 = vmatpush.xpose.msra.mxu1 %v110_v30 }
  0x46   :  { %140 = vmatpush.xpose.msra.mxu0 %v109_v31  ;;  %200 = vmatpush.xpose.msra.mxu1 %v109_v31 }
  0x4a   :  { %141 = vmatpush.xpose.msra.mxu0 %v108_v32  ;;  %201 = vmatpush.xpose.msra.mxu1 %v108_v32 }
  0x80   :  { %v60_v14 = vpop.xlane.xlu0 %59 }
  0x81   :  { %v70_v15 = vmul.f32 %v69_v13, %v60_v14 }
  0x83   :  { %v72_v17 = vsub.f32 %v57_v0, %v70_v15 }
  0x85   :  { %v74_v18 = vmul.f32 %v72_v17, %v72_v17 }
  0x87   :  { %76 = vadd.xlane.f32.xlu1 %v74_v18 }
  0x88   :  { %v62_v20 = vpop.xlane.xlu0 %61 }
  0x89   :  { %v71_v21 = vmul.f32 %v69_v13, %v62_v20 }
  0x8b   :  { %v73_v23 = vsub.f32 %v58_v1, %v71_v21 }
  0x8d   :  { %v75_v24 = vmul.f32 %v73_v23, %v73_v23 }
  0x8f   :  { %78 = vadd.xlane.f32.xlu1 %v75_v24 }
  0xfa   :  { %v77_v33 = vpop.xlane.xlu1 %76 }
  0xfb   :  { %v80_v34 = vmul.f32 0.007874016, %v77_v33 }
  0xfd   :  { %211 = vrsqrt.f32 %v80_v34  ;;  %vm88_vm2 = vweird.f32 %v80_v34 }
 0x102   :  { %v79_v35 = vpop.xlane.xlu1 %78 }
 0x103   :  { %v212_v36 = vpop.eup %211  ;;  %v81_v37 = vmul.f32 0.007874016, %v79_v35 }
 0x104   :  { %v83_v38 = vmul.f32 %v212_v36, %v80_v34  ;;  %vm89_vm1 = vweird.f32 %v212_v36 }
 0x105   :  { %213 = vrsqrt.f32 %v81_v37  ;;  %vm90_vm3 = vmor %vm88_vm2, %vm89_vm1  ;;  %vm98_vm5 = vweird.f32 %v81_v37 }
 0x106   :  { %v84_v39 = vmul.f32 %v212_v36, %v83_v38 }
 0x108   :  { %v85_v40 = vmul.f32 0.5, %v84_v39 }
 0x10a   :  { %v86_v41 = vsub.f32 1.5, %v85_v40 }
 0x10b   :  { %v214_v42 = vpop.eup %213 }
 0x10c   :  { %v93_v43 = vmul.f32 %v214_v42, %v81_v37  ;;  %v87_v44 = vmul.f32 %v212_v36, %v86_v41  ;;  %vm99_vm4 = vweird.f32 %v214_v42 }
 0x10d   :  { %vm100_vm6 = vmor %vm98_vm5, %vm99_vm4 }
 0x10e   :  { %v94_v46 = vmul.f32 %v214_v42, %v93_v43  ;;  %v91_v47 = vsel %vm90_vm3, %v212_v36, %v87_v44 }
 0x10f   :  { %v104_v48 = vmul.f32 %v103_v45, %v91_v47 }
 0x110   :  { %v95_v49 = vmul.f32 0.5, %v94_v46 }
 0x111   :  { %v106_v50 = vmul.f32 %v104_v48, %v72_v17 }
 0x112   :  { %v96_v51 = vsub.f32 1.5, %v95_v49 }
 0x113   :  { %142 = vmatmul.f32.vlgmr.msra.gmra.mxu0 %v106_v50 }
 0x114   :  { %v97_v52 = vmul.f32 %v214_v42, %v96_v51 }
 0x116   :  { %v101_v53 = vsel %vm100_vm6, %v214_v42, %v97_v52 }
 0x117   :  { %v105_v54 = vmul.f32 %v103_v45, %v101_v53 }
 0x119   :  { %v107_v55 = vmul.f32 %v105_v54, %v73_v23 }
 0x11b   :  { %145 = vmatmul.f32.vlgmr.msra.gmra.mxu1 %v107_v55 }
 0x190   :  { %v143_v57 = vpop.f32.mrf.mxu0 }
 0x191   :  { %v162_v58 = vadd.f32 %v208_v56, %v143_v57 }
 0x193   :  { %164 = vst [vmem:[#allocation9] sm:$0xff] %v162_v58 }
 0x198   :  { %v146_v59 = vpop.f32.mrf.mxu1 }
 0x199   :  { %v163_v60 = vadd.f32 %v208_v56, %v146_v59 }
 0x19b   :  { %165 = vst [vmem:[#allocation9 + $0x8] sm:$0xff] %v163_v60 }
 0x19c   :  { %178 = dma.vmem_to_hbm [thread:$0]  %s171_s29, 256, %s173_s6, [#allocation6], %s294_s23, %s294_s23, %s295_s24  }
 0x19d   :  { %291 = dma.done.wait [#allocation6], 256  }
 0x19e   :  { %292 = vsyncadd [#allocation6], 4294967040 }
 0x19f   :  { %183 = vsyncpa [#allocation5], 1 }
 0x1a0   :  { %184 = vsyncpa [#allocation8], 1 }
 0x1a1   :  { %185 = vsyncpa [#allocation6], 1 }

</bundles_post_ra>
